<compile_context>
chip_gen: v7x
topology: tpu7x:2x2x1
jax: 0.10.0
libtpu: 0.0.40
codegen_flags: <defaults>
</compile_context>

<pallas_src>
import jax
import jax.numpy as jnp
from jax.experimental import pallas as pl
from jax.experimental.pallas import tpu as pltpu


def _round_up(x, m):
    return ((x + m - 1) // m) * m


def _actor_critic_kernel(x_ref, w1_ref, b1_ref, w2_ref, b2_ref,
                         wh_ref, bh_ref, out_ref):
    """Whole forward pass for one batch tile (weights resident in VMEM)."""
    # In-kernel cast of the f32 observation tile to bf16 (free VPU work,
    # halves x-side HBM traffic vs a wrapper-side cast+copy).
    x = x_ref[...].astype(w1_ref.dtype)

    # fc1 + ReLU  (bf16 operands, f32 accumulate, f32 bias)
    h1 = jnp.dot(x, w1_ref[...], preferred_element_type=jnp.float32) + b1_ref[...]
    h1 = jnp.maximum(h1, 0.0).astype(w2_ref.dtype)

    # fc2 + ReLU
    h2 = jnp.dot(h1, w2_ref[...], preferred_element_type=jnp.float32) + b2_ref[...]
    h2 = jnp.maximum(h2, 0.0).astype(wh_ref.dtype)

    # Fused policy+value head -> narrow (TB, 8) f32 output.  Output writeback
    # is the byte bottleneck, so we emit only 8 useful-ish columns instead of
    # a 128-lane padded slab.
    out_ref[...] = (jnp.dot(h2, wh_ref[...], preferred_element_type=jnp.float32)
                    + bh_ref[...]).astype(out_ref.dtype)


def prepare_params(params, compute_dtype=jnp.bfloat16):
    """One-time parameter prep, hoisted out of the per-call path.

    - Fuses the pi and v heads into a single (fc2_dims, 8) weight / (1, 8) bias
      (columns [0:n_actions] = policy, column [n_actions] = value, rest zero).
    - Casts matmul operands to bf16; biases stay f32.
    Weights are stored (in_features, out_features) so the kernel computes x @ W.
    """
    fc2_dims, n_actions = params["wp"].shape
    out_width = _round_up(n_actions + 1, 8)

    wh = jnp.zeros((fc2_dims, out_width), jnp.float32)
    wh = wh.at[:, :n_actions].set(params["wp"])
    wh = wh.at[:, n_actions:n_actions + 1].set(params["wv"])
    bh = jnp.zeros((1, out_width), jnp.float32)
    bh = bh.at[:, :n_actions].set(params["bp"][0])
    bh = bh.at[:, n_actions:n_actions + 1].set(params["bv"][0])

    return dict(
        w1=params["w1"].astype(compute_dtype),
        b1=params["b1"].astype(jnp.float32),
        w2=params["w2"].astype(compute_dtype),
        b2=params["b2"].astype(jnp.float32),
        wh=wh.astype(compute_dtype),
        bh=bh,
    )


def actor_critic_forward(x, prep, n_actions, *, batch_tile=1024):
    """x: (B, input_dim) float32. prep: output of prepare_params.

    Returns (pi, v) with shapes (B, n_actions) and (B, 1), float32.
    """
    B, input_dim = x.shape
    out_width = prep["wh"].shape[1]

    # Batch tiling: no wrapper-side padding; ragged last block is handled by
    # Pallas (rows are independent, OOB output rows are masked on write).
    TB = min(batch_tile, _round_up(B, 8))
    # v7x has 2 TensorCores per chip: make the "parallel" grid >=2 steps when
    # the batch is big enough to split.
    if B >= 512 and pl.cdiv(B, TB) < 2:
        TB = max(256, _round_up(pl.cdiv(B, 2), 16))
    grid = (pl.cdiv(B, TB),)

    out = pl.pallas_call(
        _actor_critic_kernel,
        out_shape=jax.ShapeDtypeStruct((B, out_width), jnp.float32),
        grid_spec=pltpu.PrefetchScalarGridSpec(
            num_scalar_prefetch=0,
            grid=grid,
            in_specs=[
                pl.BlockSpec((TB, input_dim), lambda i: (i, 0)),   # x tile (f32)
                pl.BlockSpec(prep["w1"].shape, lambda i: (0, 0)),  # weights stay
                pl.BlockSpec(prep["b1"].shape, lambda i: (0, 0)),  # VMEM-resident
                pl.BlockSpec(prep["w2"].shape, lambda i: (0, 0)),
                pl.BlockSpec(prep["b2"].shape, lambda i: (0, 0)),
                pl.BlockSpec(prep["wh"].shape, lambda i: (0, 0)),
                pl.BlockSpec(prep["bh"].shape, lambda i: (0, 0)),
            ],
            out_specs=pl.BlockSpec((TB, out_width), lambda i: (i, 0)),
        ),
        compiler_params=pltpu.CompilerParams(
            dimension_semantics=("parallel",)),
    )(x, prep["w1"], prep["b1"], prep["w2"], prep["b2"],
      prep["wh"], prep["bh"])

    pi = out[:, :n_actions]
    v = out[:, n_actions:n_actions + 1]
    return pi, v


def init_params(key, input_dim, fc1_dims, fc2_dims, n_actions):
    """Deterministic init mimicking PyTorch nn.Linear (uniform +-1/sqrt(fan_in)).
    Weights stored as (in_features, out_features); biases as (1, out_features)."""
    def linear(k, fan_in, fan_out):
        kw, kb = jax.random.split(k)
        bound = 1.0 / jnp.sqrt(fan_in)
        w = jax.random.uniform(kw, (fan_in, fan_out), jnp.float32, -bound, bound)
        b = jax.random.uniform(kb, (1, fan_out), jnp.float32, -bound, bound)
        return w, b

    k1, k2, k3, k4 = jax.random.split(key, 4)
    w1, b1 = linear(k1, input_dim, fc1_dims)
    w2, b2 = linear(k2, fc1_dims, fc2_dims)
    wp, bp = linear(k3, fc2_dims, n_actions)
    wv, bv = linear(k4, fc2_dims, 1)
    return dict(w1=w1, b1=b1, w2=w2, b2=b2, wp=wp, bp=bp, wv=wv, bv=bv)


if __name__ == "__main__":
    # Small shapes consistent with the module: input_dims=(32,), fc1=64,
    # fc2=64, n_actions=4, batch=8.
    key = jax.random.PRNGKey(0)
    k_obs, k_params = jax.random.split(key)

    batch, input_dim, fc1_dims, fc2_dims, n_actions = 8, 32, 64, 64, 4

    obs = jax.random.normal(k_obs, (batch, input_dim), dtype=jnp.float32)
    params = init_params(k_params, input_dim, fc1_dims, fc2_dims, n_actions)

    # One-time param prep (fused head + bf16 casts), hoisted out of the call.
    prep = prepare_params(params)

    pi, v = actor_critic_forward(obs, prep, n_actions)
    jax.block_until_ready((pi, v))

    # Pure-JAX reference of the same math with the same bf16 operand cast
    # (accumulation in f32), so tolerances stay tight.
    bf16 = jnp.bfloat16
    xb = obs.astype(bf16)
    w1b, w2b = params["w1"].astype(bf16), params["w2"].astype(bf16)
    wpb, wvb = params["wp"].astype(bf16), params["wv"].astype(bf16)
    h1 = jnp.maximum(jnp.dot(xb, w1b, preferred_element_type=jnp.float32)
                     + params["b1"], 0.0).astype(bf16)
    h2 = jnp.maximum(jnp.dot(h1, w2b, preferred_element_type=jnp.float32)
                     + params["b2"], 0.0).astype(bf16)
    pi_ref = jnp.dot(h2, wpb, preferred_element_type=jnp.float32) + params["bp"]
    v_ref = jnp.dot(h2, wvb, preferred_element_type=jnp.float32) + params["bv"]

    assert pi.shape == (batch, n_actions) and v.shape == (batch, 1)
    assert jnp.allclose(pi, pi_ref, atol=2e-3, rtol=2e-3), "policy head mismatch"
    assert jnp.allclose(v, v_ref, atol=2e-3, rtol=2e-3), "value head mismatch"

    # Sanity vs. full-f32 math (loose tolerance for the bf16 operand cast).
    h1f = jnp.maximum(obs @ params["w1"] + params["b1"], 0.0)
    h2f = jnp.maximum(h1f @ params["w2"] + params["b2"], 0.0)
    assert jnp.allclose(pi, h2f @ params["wp"] + params["bp"], atol=5e-2), \
        "policy head far from f32 reference"
    assert jnp.allclose(v, h2f @ params["wv"] + params["bv"], atol=5e-2), \
        "value head far from f32 reference"

    # TODO(synk): optimizer (Adam) / device placement from the PyTorch module are
    # training/runtime concerns with no kernel equivalent; forward pass only.
    print("KERNEL_OK")
</pallas_src>

<mosaic_0001>
module attributes {stable_mosaic.version = 11 : i64} {
  func.func @_actor_critic_kernel(%arg0: i32, %arg1: memref<8x32xf32, #tpu.memory_space<vmem>>, %arg2: memref<32x64xbf16, #tpu.memory_space<vmem>>, %arg3: memref<1x64xf32, #tpu.memory_space<vmem>>, %arg4: memref<64x64xbf16, #tpu.memory_space<vmem>>, %arg5: memref<1x64xf32, #tpu.memory_space<vmem>>, %arg6: memref<64x8xbf16, #tpu.memory_space<vmem>>, %arg7: memref<1x8xf32, #tpu.memory_space<vmem>>, %arg8: memref<8x8xf32, #tpu.memory_space<vmem>>) attributes {dimension_semantics = [#tpu.dimension_semantics<parallel>], iteration_bounds = array<i64: 1>, scalar_prefetch = 0 : i64, scratch_operands = 0 : i64, tpu.core_type = #tpu.core_type<tc>, window_params = [{transform_indices = @transform_0, window_bounds = array<i64: 8, 32>}, {pipeline_mode = #tpu.pipeline_mode<synchronous>, transform_indices = @transform_1, window_bounds = array<i64: 32, 64>}, {pipeline_mode = #tpu.pipeline_mode<synchronous>, transform_indices = @transform_2, window_bounds = array<i64: 1, 64>}, {pipeline_mode = #tpu.pipeline_mode<synchronous>, transform_indices = @transform_3, window_bounds = array<i64: 64, 64>}, {pipeline_mode = #tpu.pipeline_mode<synchronous>, transform_indices = @transform_4, window_bounds = array<i64: 1, 64>}, {pipeline_mode = #tpu.pipeline_mode<synchronous>, transform_indices = @transform_5, window_bounds = array<i64: 64, 8>}, {pipeline_mode = #tpu.pipeline_mode<synchronous>, transform_indices = @transform_6, window_bounds = array<i64: 1, 8>}, {transform_indices = @transform_7, window_bounds = array<i64: 8, 8>}]} {
    %c0 = arith.constant 0 : index
    %c0_0 = arith.constant 0 : index
    %0 = vector.load %arg1[%c0, %c0_0] : memref<8x32xf32, #tpu.memory_space<vmem>>, vector<8x32xf32>
    %1 = arith.truncf %0 : vector<8x32xf32> to vector<8x32xbf16>
    %c0_1 = arith.constant 0 : index
    %c0_2 = arith.constant 0 : index
    %2 = vector.load %arg2[%c0_1, %c0_2] : memref<32x64xbf16, #tpu.memory_space<vmem>>, vector<32x64xbf16>
    %cst = arith.constant dense<0.000000e+00> : vector<8x64xf32>
    %3 = tpu.matmul %1, %2, %cst {dimension_numbers = #tpu.dot_dimension_numbers<[1], [0], [0], [1], [0, 0, 1, 1], [], []>} : vector<8x32xbf16>, vector<32x64xbf16>, vector<8x64xf32> -> vector<8x64xf32>
    %c0_3 = arith.constant 0 : index
    %c0_4 = arith.constant 0 : index
    %4 = vector.load %arg3[%c0_3, %c0_4] : memref<1x64xf32, #tpu.memory_space<vmem>>, vector<1x64xf32>
    %5 = vector.broadcast %4 : vector<1x64xf32> to vector<8x64xf32>
    %6 = arith.addf %3, %5 : vector<8x64xf32>
    %cst_5 = arith.constant 0.000000e+00 : f32
    %7 = vector.broadcast %cst_5 : f32 to vector<8x64xf32>
    %8 = arith.maximumf %6, %7 : vector<8x64xf32>
    %9 = arith.truncf %8 : vector<8x64xf32> to vector<8x64xbf16>
    %c0_6 = arith.constant 0 : index
    %c0_7 = arith.constant 0 : index
    %10 = vector.load %arg4[%c0_6, %c0_7] : memref<64x64xbf16, #tpu.memory_space<vmem>>, vector<64x64xbf16>
    %cst_8 = arith.constant dense<0.000000e+00> : vector<8x64xf32>
    %11 = tpu.matmul %9, %10, %cst_8 {dimension_numbers = #tpu.dot_dimension_numbers<[1], [0], [0], [1], [0, 0, 1, 1], [], []>} : vector<8x64xbf16>, vector<64x64xbf16>, vector<8x64xf32> -> vector<8x64xf32>
    %c0_9 = arith.constant 0 : index
    %c0_10 = arith.constant 0 : index
    %12 = vector.load %arg5[%c0_9, %c0_10] : memref<1x64xf32, #tpu.memory_space<vmem>>, vector<1x64xf32>
    %13 = vector.broadcast %12 : vector<1x64xf32> to vector<8x64xf32>
    %14 = arith.addf %11, %13 : vector<8x64xf32>
    %cst_11 = arith.constant 0.000000e+00 : f32
    %15 = vector.broadcast %cst_11 : f32 to vector<8x64xf32>
    %16 = arith.maximumf %14, %15 : vector<8x64xf32>
    %17 = arith.truncf %16 : vector<8x64xf32> to vector<8x64xbf16>
    %c0_12 = arith.constant 0 : index
    %c0_13 = arith.constant 0 : index
    %18 = vector.load %arg6[%c0_12, %c0_13] : memref<64x8xbf16, #tpu.memory_space<vmem>>, vector<64x8xbf16>
    %cst_14 = arith.constant dense<0.000000e+00> : vector<8x8xf32>
    %19 = tpu.matmul %17, %18, %cst_14 {dimension_numbers = #tpu.dot_dimension_numbers<[1], [0], [0], [1], [0, 0, 1, 1], [], []>} : vector<8x64xbf16>, vector<64x8xbf16>, vector<8x8xf32> -> vector<8x8xf32>
    %c0_15 = arith.constant 0 : index
    %c0_16 = arith.constant 0 : index
    %20 = vector.load %arg7[%c0_15, %c0_16] : memref<1x8xf32, #tpu.memory_space<vmem>>, vector<1x8xf32>
    %21 = vector.broadcast %20 : vector<1x8xf32> to vector<8x8xf32>
    %22 = arith.addf %19, %21 : vector<8x8xf32>
    %c0_17 = arith.constant 0 : index
    %c0_18 = arith.constant 0 : index
    %23 = vector.load %arg8[%c0_17, %c0_18] : memref<8x8xf32, #tpu.memory_space<vmem>>, vector<8x8xf32>
    tpu.vector_store %arg8[%c0_17, %c0_18], %22 {strides = array<i32>} : memref<8x8xf32, #tpu.memory_space<vmem>>, vector<8x8xf32>,
    return
  }
  func.func @transform_0(%arg0: i32) -> (i32, i32) {
    %c0_i32 = arith.constant 0 : i32
    %c0_i32_0 = arith.constant 0 : i32
    return %arg0, %c0_i32 : i32, i32
  }
  func.func @transform_1(%arg0: i32) -> (i32, i32) {
    %c0_i32 = arith.constant 0 : i32
    %c0_i32_0 = arith.constant 0 : i32
    %c0_i32_1 = arith.constant 0 : i32
    return %c0_i32, %c0_i32_0 : i32, i32
  }
  func.func @transform_2(%arg0: i32) -> (i32, i32) {
    %c0_i32 = arith.constant 0 : i32
    %c0_i32_0 = arith.constant 0 : i32
    %c0_i32_1 = arith.constant 0 : i32
    return %c0_i32, %c0_i32_0 : i32, i32
  }
  func.func @transform_3(%arg0: i32) -> (i32, i32) {
    %c0_i32 = arith.constant 0 : i32
    %c0_i32_0 = arith.constant 0 : i32
    %c0_i32_1 = arith.constant 0 : i32
    return %c0_i32, %c0_i32_0 : i32, i32
  }
  func.func @transform_4(%arg0: i32) -> (i32, i32) {
    %c0_i32 = arith.constant 0 : i32
    %c0_i32_0 = arith.constant 0 : i32
    %c0_i32_1 = arith.constant 0 : i32
    return %c0_i32, %c0_i32_0 : i32, i32
  }
  func.func @transform_5(%arg0: i32) -> (i32, i32) {
    %c0_i32 = arith.constant 0 : i32
    %c0_i32_0 = arith.constant 0 : i32
    %c0_i32_1 = arith.constant 0 : i32
    return %c0_i32, %c0_i32_0 : i32, i32
  }
  func.func @transform_6(%arg0: i32) -> (i32, i32) {
    %c0_i32 = arith.constant 0 : i32
    %c0_i32_0 = arith.constant 0 : i32
    %c0_i32_1 = arith.constant 0 : i32
    return %c0_i32, %c0_i32_0 : i32, i32
  }
  func.func @transform_7(%arg0: i32) -> (i32, i32) {
    %c0_i32 = arith.constant 0 : i32
    %c0_i32_0 = arith.constant 0 : i32
    return %arg0, %c0_i32 : i32, i32
  }
}

</mosaic_0001>

<bundles_post_ra>
// kernel: tpu_custom_call.1
= control target key start
LH: loop header
LB: loop body
LE: loop exit
PB: predicated region body
PF: predicated region fallthrough
CT: control target
= control target key end

     0   :  { %12 = vsyncpa [#allocation3], 0  ;;  %s533_s0 = inlined_call_operand.vmem [shape: f32[8,32], index: 0, kind: input, shape index: {}]   ;;  %s534_s1 = inlined_call_operand.hbm [shape: bf16[32,64], index: 1, kind: input, shape index: {}]   ;;  %s535_s2 = inlined_call_operand.vmem [shape: f32[1,64], index: 2, kind: input, shape index: {}]   ;;  %s536_s3 = inlined_call_operand.vmem [shape: bf16[64,64], index: 3, kind: input, shape index: {}]   ;;  %s537_s4 = inlined_call_operand.vmem [shape: f32[1,64], index: 4, kind: input, shape index: {}]   ;;  %s538_s5 = inlined_call_operand.vmem [shape: bf16[64,8], index: 5, kind: input, shape index: {}]   ;;  %s539_s6 = inlined_call_operand.vmem [shape: f32[1,8], index: 6, kind: input, shape index: {}]   ;;  %s540_s7 = inlined_call_operand.hbm [shape: f32[8,8], index: 7, kind: output, shape index: {}]  }
   0x1   :  { %13 = vsyncpa [#allocation4], 0  ;;  %s422_s24 = smov [#allocation2]   ;;  %s374_s28 = scalar_lea.hbm %s534_s1, 256 }
   0x2   :  { %s21_s25 = sshll.u32 %s422_s24, 4  ;;  %p375_p0 = scmp.ne.s32.totalorder %s534_s1, %s374_s28  ;;  %s22_s25 = int_to_ptr.vmem [resolvable:$true] %s21_s25 }
   0x3   :  { %p378_p1 = scmp.lt.u32.totalorder %s374_s28, %s534_s1 }
   0x5   :  { %p380_p2 = pnand %p378_p1, %p375_p0 }
   0x7   :  { %383 = shalt.err (!%p380_p2)
}
   0x8   :  { %s384_s10 = scalar_lea.vmem %s22_s25, 256  ;;  %p389_p4 = scmp.lt.s32.totalorder %s22_s25, %s22_s25 }
   0x9   :  { %p385_p3 = scmp.ne.s32.totalorder %s22_s25, %s384_s10  ;;  %p390_p5 = scmp.lt.s32.totalorder %s384_s10, %s384_s10 }
   0xb   :  { %p391_p6 = por %p390_p5, %p389_p4 }
   0xd   :  { %p392_p7 = pnand %p391_p6, %p385_p3 }
   0xf   :  { %395 = shalt.err (!%p392_p7)
}
  0x10   :  { %s423_s11 = smov 64   ;;  %s424_s12 = smov 4  }
  0x11   :  { %27 = dma.hbm_to_vmem [thread:$0]  %s534_s1, 256, %s22_s25, [#allocation3], %s423_s11, %s423_s11, %s424_s12  }
  0x12   :  { %418 = dma.done.wait [#allocation3], 256  }
  0x13   :  { %419 = vsyncadd [#allocation3], 4294967040  ;;  %v425_v0 = vmov 0.0   ;;  %vm426_vm0 = vmmov 0   ;;  %v364_v1 = vld [vmem:[#allocation2] sm:$0xff]   ;;  %v365_v2 = vld [vmem:[#allocation2 + $0x8] sm:$0xff]  }
  0x14   :  { %326 = vmatprep.subr.bf16.mxu0 %v425_v0  ;;  %330 = vmatprep.mubr.msk.bf16.mxu0 %vm426_vm0, %v425_v0  ;;  %v42_v3 = vld [vmem:[%s533_s0] sm:$0xff]  ;;  %vm67_vm1 = vcmask 261120   ;;  %v367_v5 = vld [vmem:[%s536_s3 + $0x8] sm:$0xff]   ;;  %v368_v7 = vld [vmem:[%s536_s3 + $0x10] sm:$0xff]   ;;  %vm152_vm2 = vcmask 523264   ;;  %s427_s12 = smov [#allocation5]  }
  0x15   :  { %334 = vmatprep.subr.bf16.mxu1 %v425_v0  ;;  %342 = vmatprep.mubr.msk.bf16.mxu1 %vm426_vm0, %v425_v0  ;;  %v366_v4 = vld [vmem:[%s536_s3] sm:$0xff]   ;;  %v43_v6 = vpack.c.bf16 %v42_v3, %v42_v3  ;;  %v369_v8 = vld [vmem:[%s536_s3 + $0x18] sm:$0xff]   ;;  %v371_v10 = vld [vmem:[%s538_s5 + $0x8] sm:$0xff]   ;;  %vm280_vm3 = vcmask 64512  }
  0x16   :  { %327 = vmatpush3.bf16.msra.mxu0 %v364_v1  ;;  %335 = vmatpush3.bf16.msra.mxu1 %v366_v4  ;;  %v370_v9 = vld [vmem:[%s538_s5] sm:$0xff]   ;;  %v372_v19 = vld [vmem:[%s538_s5 + $0x10] sm:$0xff]   ;;  %v373_v20 = vld [vmem:[%s538_s5 + $0x18] sm:$0xff]   ;;  %s288_s5 = sshll.u32 %s427_s12, 4  ;;  %s289_s5 = int_to_ptr.vmem [resolvable:$true] %s288_s5 }
  0x17   :  { %328 = vmatprep.subr.bf16.mxu0 %v425_v0  ;;  %336 = vmatprep.subr.bf16.mxu1 %v425_v0  ;;  %v297_v11 = vld [vmem:[%s535_s2] ss:$0 sm:$0xff]  ;;  %p401_p9 = scmp.lt.s32.totalorder %s289_s5, %s289_s5 }
  0x18   :  { %v301_v21 = vld [vmem:[%s537_s4] ss:$0 sm:$0xff]  ;;  %s396_s4 = scalar_lea.vmem %s289_s5, 128 }
  0x19   :  { %v307_v29 = vld [vmem:[%s539_s6] ss:$0 sm:$0xff]  ;;  %p397_p8 = scmp.ne.s32.totalorder %s289_s5, %s396_s4  ;;  %p402_p10 = scmp.lt.s32.totalorder %s396_s4, %s396_s4 }
  0x1a   :  { %329 = vmatpush3.bf16.msra.mxu0 %v365_v2  ;;  %337 = vmatpush3.bf16.msra.mxu1 %v367_v5 }
  0x1b   :  { %346 = vmatprep.subr.bf16.mxu0 %v425_v0  ;;  %338 = vmatprep.subr.bf16.mxu1 %v425_v0  ;;  %p403_p11 = por %p402_p10, %p401_p9 }
  0x1d   :  { %331 = vmatmul.mubr.msk.bf16.vlgmr.msra.gmra.mrb[0].mxu0 %vm67_vm1, %v43_v6  ;;  %p404_p12 = pnand %p403_p11, %p397_p8 }
  0x1e   :  { %354 = vmatprep.mubr.msk.bf16.mxu0 %vm426_vm0, %v425_v0  ;;  %339 = vmatpush3.bf16.msra.mxu1 %v368_v7 }
  0x1f   :  { %340 = vmatprep.subr.bf16.mxu1 %v425_v0  ;;  %347 = vmatpush3.bf16.msra.mxu0 %v370_v9 }
  0x20   :  { %348 = vmatprep.subr.bf16.mxu0 %v425_v0 }
  0x22   :  { %341 = vmatpush3.bf16.msra.mxu1 %v369_v8 }
  0x23   :  { %349 = vmatpush3.bf16.msra.mxu0 %v371_v10 }
  0x24   :  { %350 = vmatprep.subr.bf16.mxu0 %v425_v0 }
  0x27   :  { %351 = vmatpush3.bf16.msra.mxu0 %v372_v19 }
  0x28   :  { %352 = vmatprep.subr.bf16.mxu0 %v425_v0 }
  0x2b   :  { %353 = vmatpush3.bf16.msra.mxu0 %v373_v20 }
  0xf0   :  { %v105_v12 = vpop.f32.mrb[0].mxu0 }
  0xf1   :  { %v106_v13 = vadd.f32 %v297_v11, %v105_v12  ;;  %v332_v14 = vpop.f32.mrb[1].mxu0 }
  0xf2   :  { %v108_v15 = vpop.f32.mrb[2].mxu0 }
  0xf3   :  { %v111_v16 = vmax.f32 %v106_v13, 0.0  ;;  %v333_v17 = vpop.f32.mrb[3].mxu0 }
  0xf5   :  { %v112_v18 = vpack.c.bf16 %v111_v16, %v111_v16 }
  0xf7   :  { %343 = vmatmul.mubr.msk.bf16.vlgmr.msra.gmra.mrb[0].mxu1 %vm152_vm2, %v112_v18 }
 0x1ca   :  { %v190_v22 = vpop.f32.mrb[0].mxu1 }
 0x1cb   :  { %v191_v23 = vadd.f32 %v301_v21, %v190_v22  ;;  %v344_v24 = vpop.f32.mrb[1].mxu1 }
 0x1cc   :  { %v193_v25 = vpop.f32.mrb[2].mxu1 }
 0x1cd   :  { %v196_v26 = vmax.f32 %v191_v23, 0.0  ;;  %v345_v27 = vpop.f32.mrb[3].mxu1 }
 0x1cf   :  { %v197_v28 = vpack.c.bf16 %v196_v26, %v196_v26 }
 0x1d1   :  { %355 = vmatmul.mubr.msk.bf16.vlgmr.msra.gmra.mrb[4].mxu0 %vm152_vm2, %v197_v28 }
 0x2a4   :  { %v274_v30 = vpop.f32.mrb[4].mxu0 }
 0x2a5   :  { %v275_v31 = vadd.f32 %v307_v29, %v274_v30  ;;  %v356_v32 = vpop.f32.mrb[5].mxu0 }
 0x2a6   :  { %v277_v33 = vpop.f32.mrb[6].mxu0 }
 0x2a7   :  { %v357_v34 = vpop.f32.mrb[7].mxu0  ;;  %281 = vst.msk [vmem:[#allocation5] sm:$0xff] %vm280_vm3, %v275_v31 }
 0x2a8   :  { %407 = shalt.err (!%p404_p12)
}
 0x2a9   :  { %s408_s6 = scalar_lea.hbm %s540_s7, 128 }
 0x2aa   :  { %p409_p13 = scmp.ne.s32.totalorder %s540_s7, %s408_s6  ;;  %p412_p0 = scmp.lt.u32.totalorder %s408_s6, %s540_s7 }
 0x2ac   :  { %p414_p1 = pnand %p412_p0, %p409_p13 }
 0x2ae   :  { %417 = shalt.err (!%p414_p1)
}
 0x2af   :  { %291 = dma.vmem_to_hbm [thread:$0]  %s289_s5, 128, %s540_s7, [#allocation4]  }
 0x2b0   :  { %420 = dma.done.wait [#allocation4], 128  }
 0x2b1   :  { %421 = vsyncadd [#allocation4], 4294967168 }
 0x2b2   :  { %295 = vsyncpa [#allocation3], 1 }
 0x2b3   :  { %296 = vsyncpa [#allocation4], 1 }

</bundles_post_ra>
